<compile_context>
chip_gen: v7x
topology: tpu7x:2x2x1
jax: 0.10.0
libtpu: 0.0.40
codegen_flags: <defaults>
</compile_context>

<pallas_src>
from functools import lru_cache

import numpy as np
import jax
import jax.numpy as jnp
from jax.experimental import pallas as pl
from jax.experimental.pallas import tpu as pltpu

C1 = 0.01 ** 2
C2 = 0.03 ** 2


# --------------------------------------------------------------------------
# Hardware query (generation-aware budgets; guarded so it can never crash).
# --------------------------------------------------------------------------
def _tpu_limits():
    vmem_cap = 128 * 2 ** 20      # v5e / v6e default
    num_cores = 1
    lane_align = 256              # v6e / v7x MXU width
    try:
        info = pltpu.get_tpu_info()
        vmem_cap = int(getattr(info, "vmem_capacity_bytes", vmem_cap))
    except Exception:
        pass
    try:
        kind = jax.devices()[0].device_kind.lower()
        if "v5" in kind:
            lane_align = 128      # 4x128^2 MXU on v5e
        if ("v7" in kind) or ("7x" in kind):
            num_cores = 2         # two TensorCores share the "parallel" grid
    except Exception:
        pass
    return vmem_cap, num_cores, lane_align


# --------------------------------------------------------------------------
# Gaussian band matrices (numpy, cached per configuration, shipped as bf16).
# --------------------------------------------------------------------------
def _gaussian_1d_np(window_size: int, sigma: float) -> np.ndarray:
    x = np.arange(window_size, dtype=np.float64) - window_size // 2
    g = np.exp(-(x ** 2) / (2.0 * sigma ** 2))
    return (g / g.sum()).astype(np.float32)


def _band_matrix_np(n: int, g: np.ndarray) -> np.ndarray:
    """M[i, p] = g[p - i + half] (zero outside the band).

    (M @ X) reproduces F.conv2d's zero-padded cross-correlation along rows;
    (X @ M) does the same along columns (g is symmetric).
    """
    ws = g.shape[0]
    half = ws // 2
    m = np.zeros((n, n), dtype=np.float32)
    for i in range(n):
        lo = max(0, i - half)
        hi = min(n, i + half + 1)
        m[i, lo:hi] = g[lo - i + half: hi - i + half]
    return m


@lru_cache(maxsize=None)
def _blur_constants(H, W, b_cols, window_size, sigma, kron_rows, kron_cols):
    g = _gaussian_1d_np(window_size, sigma)
    mh = _band_matrix_np(H, g)
    mw = _band_matrix_np(W, g)
    if kron_rows:
        mh = np.kron(np.eye(5, dtype=np.float32), mh)        # (5H, 5H)
    if kron_cols:
        mw = np.kron(np.eye(b_cols, dtype=np.float32), mw)   # (B*W, B*W)
    # bf16 weights feed the MXU (f32 accumulation); values like the Gaussian
    # taps lose ~0.4% precision, which only perturbs the loss at the 1e-3
    # level (identical inputs still give SSIM == 1 exactly).
    return (jnp.asarray(mh, dtype=jnp.bfloat16),
            jnp.asarray(mw, dtype=jnp.bfloat16))


# --------------------------------------------------------------------------
# VMEM footprint model + plane-count choice.
# --------------------------------------------------------------------------
def _step_footprint(b, H, W, in_itemsize, const_bufs, kron_rows, kron_cols):
    bw = b * W
    mh_n = 5 * H if kron_rows else H
    mw_n = bw if kron_cols else W
    return (2 * 2 * H * bw * in_itemsize                   # x, y blocks, double-buffered
            + const_bufs * 2 * (mh_n * mh_n + mw_n * mw_n)  # bf16 band matrices
            + 24 * 5 * H * bw)                              # in-kernel f32/bf16 temporaries


def _choose_planes_per_step(P, H, W, in_itemsize, budget, lane_align,
                            prefer_multi_step, kron_rows, kron_cols):
    """Largest divisor B of P that fits the VMEM budget, preferring MXU-width
    aligned lane slabs and (on multi-core chips) at least two grid steps."""
    def valid(b):
        # Lane constraint: block (H, b*W) must equal the full array dim or be
        # a multiple of 128 lanes.
        return P % b == 0 and (b == P or (b * W) % 128 == 0)

    cands = [b for b in range(1, P + 1)
             if valid(b)
             and _step_footprint(b, H, W, in_itemsize, 1,
                                 kron_rows, kron_cols) <= budget]
    if not cands:
        # Nothing fits the budget: take the smallest valid tile (still correct).
        return min(b for b in range(1, P + 1) if valid(b))
    if prefer_multi_step and any(P // b >= 2 for b in cands):
        cands = [b for b in cands if P // b >= 2]
    aligned = [b for b in cands if (b * W) % lane_align == 0]
    if aligned:
        cands = aligned
    return max(cands)


# --------------------------------------------------------------------------
# Kernel.
# --------------------------------------------------------------------------
def _make_ssim_kernel(H, W, B, kron_rows, kron_cols):
    BW = B * W

    def kernel(x_ref, y_ref, mh_ref, mw_ref, o_ref):
        # (H, B*W) slab holding B planes side-by-side along the lane axis.
        x = x_ref[...].astype(jnp.float32)
        y = y_ref[...].astype(jnp.float32)

        # Five fields stacked along sublanes -> (5H, B*W); cast to bf16 for the
        # MXU (f32 accumulate).  H is a multiple of 8 in the test, so the stack
        # offsets and the blurred[k*H:(k+1)*H] slices stay tile-aligned.
        fields = jnp.concatenate([x, y, x * x, y * y, x * y], axis=0)
        fields = fields.astype(jnp.bfloat16)

        mh = mh_ref[...]
        if kron_rows:
            # (I_5 kron M_h) @ fields : one wide MXU matmul (best for small H).
            t = jnp.dot(mh, fields, preferred_element_type=jnp.float32)
        else:
            # Single (H, H) band matrix, contracted per field: 5x fewer MACs
            # and a 25x smaller operand for large H.
            f3 = fields.reshape(5, H, BW)
            t = jnp.einsum("hk,fkw->fhw", mh, f3,
                           preferred_element_type=jnp.float32).reshape(5 * H, BW)

        t = t.astype(jnp.bfloat16)
        mw = mw_ref[...]
        if kron_cols:
            # t @ (I_B kron M_w): lane-dense single matmul (best for small W).
            blurred = jnp.dot(t, mw, preferred_element_type=jnp.float32)
        else:
            # Per-plane contraction against a single (W, W) band matrix:
            # removes the (B*W)^2 VMEM term and B-fold wasted MACs (large W).
            blurred = jnp.dot(t.reshape(5 * H * B, W), mw,
                              preferred_element_type=jnp.float32).reshape(5 * H, BW)

        mu1 = blurred[0 * H:1 * H]
        mu2 = blurred[1 * H:2 * H]
        bxx = blurred[2 * H:3 * H]
        byy = blurred[3 * H:4 * H]
        bxy = blurred[4 * H:5 * H]

        mu1_sq = mu1 * mu1
        mu2_sq = mu2 * mu2
        mu1_mu2 = mu1 * mu2
        sigma1_sq = bxx - mu1_sq
        sigma2_sq = byy - mu2_sq
        sigma12 = bxy - mu1_mu2

        ssim_map = ((2.0 * mu1_mu2 + C1) * (2.0 * sigma12 + C2)) / (
            (mu1_sq + mu2_sq + C1) * (sigma1_sq + sigma2_sq + C2))

        # Per-program partial sum (no shared accumulator) so the grid axis can
        # stay "parallel"; the wrapper reads [i, 0, 0] and does the final mean.
        o_ref[...] = jnp.full((1, 8, 128), jnp.sum(ssim_map), dtype=jnp.float32)

    return kernel


def _ssim_partials(xr, yr, mh, mw, *, H, W, B, G, kron_rows, kron_cols, vmem_limit):
    kernel = _make_ssim_kernel(H, W, B, kron_rows, kron_cols)

    def build(const_buffers):
        const_kw = {}
        if const_buffers == 1:
            # Grid-invariant operands (constant index_map) don't need double
            # buffering; this halves their VMEM so a larger B fits the budget.
            const_kw = dict(pipeline_mode=pl.Buffered(1))
        in_specs = [
            pl.BlockSpec((H, B * W), lambda i: (0, i)),
            pl.BlockSpec((H, B * W), lambda i: (0, i)),
            pl.BlockSpec(mh.shape, lambda i: (0, 0), **const_kw),
            pl.BlockSpec(mw.shape, lambda i: (0, 0), **const_kw),
        ]
        return pl.pallas_call(
            kernel,
            out_shape=jax.ShapeDtypeStruct((G, 8, 128), jnp.float32),
            grid=(G,),
            in_specs=in_specs,
            out_specs=pl.BlockSpec((1, 8, 128), lambda i: (i, 0, 0)),
            compiler_params=pltpu.CompilerParams(
                dimension_semantics=("parallel",),
                vmem_limit_bytes=vmem_limit),
        )

    try:
        return build(1)(xr, yr, mh, mw)
    except Exception:
        # Robust fallback: if this jax build rejects pipeline_mode=Buffered(1),
        # rerun with default double-buffered constants (correct, more VMEM).
        return build(2)(xr, yr, mh, mw)


# --------------------------------------------------------------------------
# Public entry point: loss = -SSIM(images_1, images_2), inputs NCHW.
# --------------------------------------------------------------------------
def dissim_loss(images_1, images_2, window_size: int = 11, sigma: float = 1.5):
    assert images_1.shape == images_2.shape
    N, C, H, W = images_1.shape
    P = N * C

    vmem_cap, num_cores, lane_align = _tpu_limits()
    budget = int(0.35 * vmem_cap)           # ~45 MiB on v5e/v6e, ~22 MiB on v7x

    kron_rows = H < 64                      # small H: block-diagonal kron fills the MXU
    kron_cols = (W < 128) or (W % 128 != 0)  # small W: lane-dense kron cols blur

    in_itemsize = jnp.dtype(images_1.dtype).itemsize
    B = _choose_planes_per_step(P, H, W, in_itemsize, budget, lane_align,
                                prefer_multi_step=(num_cores > 1),
                                kron_rows=kron_rows, kron_cols=kron_cols)
    G = P // B

    mh, mw = _blur_constants(H, W, B if kron_cols else 1, window_size,
                             float(sigma), bool(kron_rows), bool(kron_cols))

    # Re-lay planes as (H, P*W): column p*W + w holds plane p, column w.
    # Original dtype kept through HBM->VMEM; f32 cast happens in-kernel.
    # (An in-kernel relayout from a 3-D BlockSpec would avoid this extra HBM
    #  pass at production sizes; negligible at module-test scale.)
    xr = jnp.transpose(images_1.reshape(P, H, W), (1, 0, 2)).reshape(H, P * W)
    yr = jnp.transpose(images_2.reshape(P, H, W), (1, 0, 2)).reshape(H, P * W)

    # vmem_limit: pessimistic footprint (double-buffered constants, so the
    # fallback path also fits) but never more than ~75% of physical VMEM.
    fp2 = _step_footprint(B, H, W, in_itemsize, 2, kron_rows, kron_cols)
    vmem_limit = int(min(int(0.75 * vmem_cap),
                         max(32 * 2 ** 20, fp2 + (4 << 20))))

    partials = _ssim_partials(xr, yr, mh, mw, H=H, W=W, B=B, G=G,
                              kron_rows=kron_rows, kron_cols=kron_cols,
                              vmem_limit=vmem_limit)

    ssim_mean = jnp.sum(partials[:, 0, 0]) / (P * H * W)
    return -ssim_mean


if __name__ == "__main__":
    key = jax.random.PRNGKey(0)
    k1, k2 = jax.random.split(key)
    # Small shapes consistent with the module: batch=2, channels=4, 16x16 images.
    images_1 = jax.random.uniform(k1, (2, 4, 16, 16), dtype=jnp.float32)
    images_2 = jax.random.uniform(k2, (2, 4, 16, 16), dtype=jnp.float32)

    loss = dissim_loss(images_1, images_2)
    jax.block_until_ready(loss)

    # Sanity: identical images -> SSIM == 1 -> loss == -1 (exact even with the
    # bf16 MXU path, since numerator and denominator are bitwise identical).
    loss_same = dissim_loss(images_1, images_1)
    jax.block_until_ready(loss_same)
    assert abs(float(loss_same) + 1.0) < 1e-3, float(loss_same)
    assert float(loss) > -1.0

    print("KERNEL_OK")
</pallas_src>

<mosaic_0001>
module attributes {stable_mosaic.version = 11 : i64} {
  func.func @kernel(%arg0: i32, %arg1: memref<16x128xf32, #tpu.memory_space<vmem>>, %arg2: memref<16x128xf32, #tpu.memory_space<vmem>>, %arg3: memref<80x80xbf16, #tpu.memory_space<vmem>>, %arg4: memref<128x128xbf16, #tpu.memory_space<vmem>>, %arg5: memref<1x8x128xf32, #tpu.memory_space<vmem>>) attributes {dimension_semantics = [#tpu.dimension_semantics<parallel>], iteration_bounds = array<i64: 1>, scalar_prefetch = 0 : i64, scratch_operands = 0 : i64, tpu.core_type = #tpu.core_type<tc>, window_params = [{transform_indices = @transform_0, window_bounds = array<i64: 16, 128>}, {transform_indices = @transform_1, window_bounds = array<i64: 16, 128>}, {pipeline_mode = #tpu.pipeline_mode<synchronous>, transform_indices = @transform_2, window_bounds = array<i64: 80, 80>}, {pipeline_mode = #tpu.pipeline_mode<synchronous>, transform_indices = @transform_3, window_bounds = array<i64: 128, 128>}, {transform_indices = @transform_4, window_bounds = array<i64: 1, 8, 128>}]} {
    %c0 = arith.constant 0 : index
    %c0_0 = arith.constant 0 : index
    %0 = vector.load %arg1[%c0, %c0_0] : memref<16x128xf32, #tpu.memory_space<vmem>>, vector<16x128xf32>
    %c0_1 = arith.constant 0 : index
    %c0_2 = arith.constant 0 : index
    %1 = vector.load %arg2[%c0_1, %c0_2] : memref<16x128xf32, #tpu.memory_space<vmem>>, vector<16x128xf32>
    %2 = arith.mulf %0, %0 : vector<16x128xf32>
    %3 = arith.mulf %1, %1 : vector<16x128xf32>
    %4 = arith.mulf %0, %1 : vector<16x128xf32>
    %5 = tpu.concatenate %0, %1, %2, %3, %4 in 0 : vector<16x128xf32>, vector<16x128xf32>, vector<16x128xf32>, vector<16x128xf32>, vector<16x128xf32> -> vector<80x128xf32>
    %6 = arith.truncf %5 : vector<80x128xf32> to vector<80x128xbf16>
    %c0_3 = arith.constant 0 : index
    %c0_4 = arith.constant 0 : index
    %7 = vector.load %arg3[%c0_3, %c0_4] : memref<80x80xbf16, #tpu.memory_space<vmem>>, vector<80x80xbf16>
    %cst = arith.constant dense<0.000000e+00> : vector<80x128xf32>
    %8 = tpu.matmul %7, %6, %cst {dimension_numbers = #tpu.dot_dimension_numbers<[1], [0], [0], [1], [0, 0, 1, 1], [], []>} : vector<80x80xbf16>, vector<80x128xbf16>, vector<80x128xf32> -> vector<80x128xf32>
    %9 = arith.truncf %8 : vector<80x128xf32> to vector<80x128xbf16>
    %c0_5 = arith.constant 0 : index
    %c0_6 = arith.constant 0 : index
    %10 = vector.load %arg4[%c0_5, %c0_6] : memref<128x128xbf16, #tpu.memory_space<vmem>>, vector<128x128xbf16>
    %cst_7 = arith.constant dense<0.000000e+00> : vector<80x128xf32>
    %11 = tpu.matmul %9, %10, %cst_7 {dimension_numbers = #tpu.dot_dimension_numbers<[1], [0], [0], [1], [0, 0, 1, 1], [], []>} : vector<80x128xbf16>, vector<128x128xbf16>, vector<80x128xf32> -> vector<80x128xf32>
    %12 = vector.extract_strided_slice %11 {offsets = [0, 0], sizes = [16, 128], strides = [1, 1]} : vector<80x128xf32> to vector<16x128xf32>
    %13 = vector.extract_strided_slice %11 {offsets = [16, 0], sizes = [16, 128], strides = [1, 1]} : vector<80x128xf32> to vector<16x128xf32>
    %14 = vector.extract_strided_slice %11 {offsets = [32, 0], sizes = [16, 128], strides = [1, 1]} : vector<80x128xf32> to vector<16x128xf32>
    %15 = vector.extract_strided_slice %11 {offsets = [48, 0], sizes = [16, 128], strides = [1, 1]} : vector<80x128xf32> to vector<16x128xf32>
    %16 = vector.extract_strided_slice %11 {offsets = [64, 0], sizes = [16, 128], strides = [1, 1]} : vector<80x128xf32> to vector<16x128xf32>
    %17 = arith.mulf %12, %12 : vector<16x128xf32>
    %18 = arith.mulf %13, %13 : vector<16x128xf32>
    %19 = arith.mulf %12, %13 : vector<16x128xf32>
    %20 = arith.subf %14, %17 : vector<16x128xf32>
    %21 = arith.subf %15, %18 : vector<16x128xf32>
    %22 = arith.subf %16, %19 : vector<16x128xf32>
    %cst_8 = arith.constant 2.000000e+00 : f32
    %23 = vector.broadcast %cst_8 : f32 to vector<16x128xf32>
    %24 = arith.mulf %23, %19 : vector<16x128xf32>
    %cst_9 = arith.constant 9.99999974E-5 : f32
    %25 = vector.broadcast %cst_9 : f32 to vector<16x128xf32>
    %26 = arith.addf %24, %25 : vector<16x128xf32>
    %cst_10 = arith.constant 2.000000e+00 : f32
    %27 = vector.broadcast %cst_10 : f32 to vector<16x128xf32>
    %28 = arith.mulf %27, %22 : vector<16x128xf32>
    %cst_11 = arith.constant 8.99999984E-4 : f32
    %29 = vector.broadcast %cst_11 : f32 to vector<16x128xf32>
    %30 = arith.addf %28, %29 : vector<16x128xf32>
    %31 = arith.mulf %26, %30 : vector<16x128xf32>
    %32 = arith.addf %17, %18 : vector<16x128xf32>
    %cst_12 = arith.constant 9.99999974E-5 : f32
    %33 = vector.broadcast %cst_12 : f32 to vector<16x128xf32>
    %34 = arith.addf %32, %33 : vector<16x128xf32>
    %35 = arith.addf %20, %21 : vector<16x128xf32>
    %cst_13 = arith.constant 8.99999984E-4 : f32
    %36 = vector.broadcast %cst_13 : f32 to vector<16x128xf32>
    %37 = arith.addf %35, %36 : vector<16x128xf32>
    %38 = arith.mulf %34, %37 : vector<16x128xf32>
    %39 = arith.divf %31, %38 : vector<16x128xf32>
    %40 = vector.shape_cast %39 : vector<16x128xf32> to vector<1x16x128xf32>
    %cst_14 = arith.constant dense<0.000000e+00> : vector<1xf32>
    %41 = vector.multi_reduction <add>, %40, %cst_14 [1, 2] : vector<1x16x128xf32> to vector<1xf32>
    %42 = vector.shape_cast %41 : vector<1xf32> to vector<1x1x1xf32>
    %43 = vector.extract %42[0, 0, 0] : f32 from vector<1x1x1xf32>
    %44 = vector.broadcast %43 : f32 to vector<1x8x128xf32>
    %c0_15 = arith.constant 0 : index
    %c0_16 = arith.constant 0 : index
    %c0_17 = arith.constant 0 : index
    %45 = vector.load %arg5[%c0_15, %c0_16, %c0_17] : memref<1x8x128xf32, #tpu.memory_space<vmem>>, vector<1x8x128xf32>
    tpu.vector_store %arg5[%c0_15, %c0_16, %c0_17], %44 {strides = array<i32>} : memref<1x8x128xf32, #tpu.memory_space<vmem>>, vector<1x8x128xf32>,
    return
  }
  func.func @transform_0(%arg0: i32) -> (i32, i32) {
    %c0_i32 = arith.constant 0 : i32
    %c0_i32_0 = arith.constant 0 : i32
    return %c0_i32, %arg0 : i32, i32
  }
  func.func @transform_1(%arg0: i32) -> (i32, i32) {
    %c0_i32 = arith.constant 0 : i32
    %c0_i32_0 = arith.constant 0 : i32
    return %c0_i32, %arg0 : i32, i32
  }
  func.func @transform_2(%arg0: i32) -> (i32, i32) {
    %c0_i32 = arith.constant 0 : i32
    %c0_i32_0 = arith.constant 0 : i32
    %c0_i32_1 = arith.constant 0 : i32
    return %c0_i32, %c0_i32_0 : i32, i32
  }
  func.func @transform_3(%arg0: i32) -> (i32, i32) {
    %c0_i32 = arith.constant 0 : i32
    %c0_i32_0 = arith.constant 0 : i32
    %c0_i32_1 = arith.constant 0 : i32
    return %c0_i32, %c0_i32_0 : i32, i32
  }
  func.func @transform_4(%arg0: i32) -> (i32, i32, i32) {
    %c0_i32 = arith.constant 0 : i32
    %c0_i32_0 = arith.constant 0 : i32
    %c0_i32_1 = arith.constant 0 : i32
    return %arg0, %c0_i32, %c0_i32_0 : i32, i32, i32
  }
}

module attributes {stable_mosaic.version = 11 : i64} {
  func.func @kernel(%arg0: i32, %arg1: memref<16x128xf32, #tpu.memory_space<vmem>>, %arg2: memref<16x128xf32, #tpu.memory_space<vmem>>, %arg3: memref<80x80xbf16, #tpu.memory_space<vmem>>, %arg4: memref<128x128xbf16, #tpu.memory_space<vmem>>, %arg5: memref<1x8x128xf32, #tpu.memory_space<vmem>>) attributes {dimension_semantics = [#tpu.dimension_semantics<parallel>], iteration_bounds = array<i64: 1>, scalar_prefetch = 0 : i64, scratch_operands = 0 : i64, tpu.core_type = #tpu.core_type<tc>, window_params = [{transform_indices = @transform_0, window_bounds = array<i64: 16, 128>}, {transform_indices = @transform_1, window_bounds = array<i64: 16, 128>}, {pipeline_mode = #tpu.pipeline_mode<synchronous>, transform_indices = @transform_2, window_bounds = array<i64: 80, 80>}, {pipeline_mode = #tpu.pipeline_mode<synchronous>, transform_indices = @transform_3, window_bounds = array<i64: 128, 128>}, {transform_indices = @transform_4, window_bounds = array<i64: 1, 8, 128>}]} {
    %c0 = arith.constant 0 : index
    %c0_0 = arith.constant 0 : index
    %0 = vector.load %arg1[%c0, %c0_0] : memref<16x128xf32, #tpu.memory_space<vmem>>, vector<16x128xf32>
    %c0_1 = arith.constant 0 : index
    %c0_2 = arith.constant 0 : index
    %1 = vector.load %arg2[%c0_1, %c0_2] : memref<16x128xf32, #tpu.memory_space<vmem>>, vector<16x128xf32>
    %2 = arith.mulf %0, %0 : vector<16x128xf32>
    %3 = arith.mulf %1, %1 : vector<16x128xf32>
    %4 = arith.mulf %0, %1 : vector<16x128xf32>
    %5 = tpu.concatenate %0, %1, %2, %3, %4 in 0 : vector<16x128xf32>, vector<16x128xf32>, vector<16x128xf32>, vector<16x128xf32>, vector<16x128xf32> -> vector<80x128xf32>
    %6 = arith.truncf %5 : vector<80x128xf32> to vector<80x128xbf16>
    %c0_3 = arith.constant 0 : index
    %c0_4 = arith.constant 0 : index
    %7 = vector.load %arg3[%c0_3, %c0_4] : memref<80x80xbf16, #tpu.memory_space<vmem>>, vector<80x80xbf16>
    %cst = arith.constant dense<0.000000e+00> : vector<80x128xf32>
    %8 = tpu.matmul %7, %6, %cst {dimension_numbers = #tpu.dot_dimension_numbers<[1], [0], [0], [1], [0, 0, 1, 1], [], []>} : vector<80x80xbf16>, vector<80x128xbf16>, vector<80x128xf32> -> vector<80x128xf32>
    %9 = arith.truncf %8 : vector<80x128xf32> to vector<80x128xbf16>
    %c0_5 = arith.constant 0 : index
    %c0_6 = arith.constant 0 : index
    %10 = vector.load %arg4[%c0_5, %c0_6] : memref<128x128xbf16, #tpu.memory_space<vmem>>, vector<128x128xbf16>
    %cst_7 = arith.constant dense<0.000000e+00> : vector<80x128xf32>
    %11 = tpu.matmul %9, %10, %cst_7 {dimension_numbers = #tpu.dot_dimension_numbers<[1], [0], [0], [1], [0, 0, 1, 1], [], []>} : vector<80x128xbf16>, vector<128x128xbf16>, vector<80x128xf32> -> vector<80x128xf32>
    %12 = vector.extract_strided_slice %11 {offsets = [0, 0], sizes = [16, 128], strides = [1, 1]} : vector<80x128xf32> to vector<16x128xf32>
    %13 = vector.extract_strided_slice %11 {offsets = [16, 0], sizes = [16, 128], strides = [1, 1]} : vector<80x128xf32> to vector<16x128xf32>
    %14 = vector.extract_strided_slice %11 {offsets = [32, 0], sizes = [16, 128], strides = [1, 1]} : vector<80x128xf32> to vector<16x128xf32>
    %15 = vector.extract_strided_slice %11 {offsets = [48, 0], sizes = [16, 128], strides = [1, 1]} : vector<80x128xf32> to vector<16x128xf32>
    %16 = vector.extract_strided_slice %11 {offsets = [64, 0], sizes = [16, 128], strides = [1, 1]} : vector<80x128xf32> to vector<16x128xf32>
    %17 = arith.mulf %12, %12 : vector<16x128xf32>
    %18 = arith.mulf %13, %13 : vector<16x128xf32>
    %19 = arith.mulf %12, %13 : vector<16x128xf32>
    %20 = arith.subf %14, %17 : vector<16x128xf32>
    %21 = arith.subf %15, %18 : vector<16x128xf32>
    %22 = arith.subf %16, %19 : vector<16x128xf32>
    %cst_8 = arith.constant 2.000000e+00 : f32
    %23 = vector.broadcast %cst_8 : f32 to vector<16x128xf32>
    %24 = arith.mulf %23, %19 : vector<16x128xf32>
    %cst_9 = arith.constant 9.99999974E-5 : f32
    %25 = vector.broadcast %cst_9 : f32 to vector<16x128xf32>
    %26 = arith.addf %24, %25 : vector<16x128xf32>
    %cst_10 = arith.constant 2.000000e+00 : f32
    %27 = vector.broadcast %cst_10 : f32 to vector<16x128xf32>
    %28 = arith.mulf %27, %22 : vector<16x128xf32>
    %cst_11 = arith.constant 8.99999984E-4 : f32
    %29 = vector.broadcast %cst_11 : f32 to vector<16x128xf32>
    %30 = arith.addf %28, %29 : vector<16x128xf32>
    %31 = arith.mulf %26, %30 : vector<16x128xf32>
    %32 = arith.addf %17, %18 : vector<16x128xf32>
    %cst_12 = arith.constant 9.99999974E-5 : f32
    %33 = vector.broadcast %cst_12 : f32 to vector<16x128xf32>
    %34 = arith.addf %32, %33 : vector<16x128xf32>
    %35 = arith.addf %20, %21 : vector<16x128xf32>
    %cst_13 = arith.constant 8.99999984E-4 : f32
    %36 = vector.broadcast %cst_13 : f32 to vector<16x128xf32>
    %37 = arith.addf %35, %36 : vector<16x128xf32>
    %38 = arith.mulf %34, %37 : vector<16x128xf32>
    %39 = arith.divf %31, %38 : vector<16x128xf32>
    %40 = vector.shape_cast %39 : vector<16x128xf32> to vector<1x16x128xf32>
    %cst_14 = arith.constant dense<0.000000e+00> : vector<1xf32>
    %41 = vector.multi_reduction <add>, %40, %cst_14 [1, 2] : vector<1x16x128xf32> to vector<1xf32>
    %42 = vector.shape_cast %41 : vector<1xf32> to vector<1x1x1xf32>
    %43 = vector.extract %42[0, 0, 0] : f32 from vector<1x1x1xf32>
    %44 = vector.broadcast %43 : f32 to vector<1x8x128xf32>
    %c0_15 = arith.constant 0 : index
    %c0_16 = arith.constant 0 : index
    %c0_17 = arith.constant 0 : index
    %45 = vector.load %arg5[%c0_15, %c0_16, %c0_17] : memref<1x8x128xf32, #tpu.memory_space<vmem>>, vector<1x8x128xf32>
    tpu.vector_store %arg5[%c0_15, %c0_16, %c0_17], %44 {strides = array<i32>} : memref<1x8x128xf32, #tpu.memory_space<vmem>>, vector<1x8x128xf32>,
    return
  }
  func.func @transform_0(%arg0: i32) -> (i32, i32) {
    %c0_i32 = arith.constant 0 : i32
    %c0_i32_0 = arith.constant 0 : i32
    return %c0_i32, %arg0 : i32, i32
  }
  func.func @transform_1(%arg0: i32) -> (i32, i32) {
    %c0_i32 = arith.constant 0 : i32
    %c0_i32_0 = arith.constant 0 : i32
    return %c0_i32, %arg0 : i32, i32
  }
  func.func @transform_2(%arg0: i32) -> (i32, i32) {
    %c0_i32 = arith.constant 0 : i32
    %c0_i32_0 = arith.constant 0 : i32
    %c0_i32_1 = arith.constant 0 : i32
    return %c0_i32, %c0_i32_0 : i32, i32
  }
  func.func @transform_3(%arg0: i32) -> (i32, i32) {
    %c0_i32 = arith.constant 0 : i32
    %c0_i32_0 = arith.constant 0 : i32
    %c0_i32_1 = arith.constant 0 : i32
    return %c0_i32, %c0_i32_0 : i32, i32
  }
  func.func @transform_4(%arg0: i32) -> (i32, i32, i32) {
    %c0_i32 = arith.constant 0 : i32
    %c0_i32_0 = arith.constant 0 : i32
    %c0_i32_1 = arith.constant 0 : i32
    return %arg0, %c0_i32, %c0_i32_0 : i32, i32, i32
  }
}

</mosaic_0001>

<bundles_post_ra>
// kernel: tpu_custom_call.1
= control target key start
LH: loop header
LB: loop body
LE: loop exit
PB: predicated region body
PF: predicated region fallthrough
CT: control target
= control target key end

     0   :  { %9 = vsyncpa [#allocation3], 0  ;;  %s816_s0 = inlined_call_operand.hbm [shape: f32[16,128], index: 0, kind: input, shape index: {}]   ;;  %s817_s1 = inlined_call_operand.hbm [shape: f32[16,128], index: 1, kind: input, shape index: {}]   ;;  %s818_s2 = inlined_call_operand.hbm [shape: bf16[80,80], index: 2, kind: input, shape index: {}]   ;;  %s819_s3 = inlined_call_operand.hbm [shape: bf16[128,128], index: 3, kind: input, shape index: {}]   ;;  %s820_s4 = inlined_call_operand.hbm [shape: f32[1,8,128], index: 4, kind: output, shape index: {}]  }
   0x1   :  { %10 = vsyncpa [#allocation6], 0 }
   0x2   :  { %11 = vsyncpa [#allocation9], 0 }
   0x3   :  { %12 = vsyncpa [#allocation4], 0  ;;  %s675_s15 = smov [#allocation5]   ;;  %s676_s17 = smov [#allocation2]  }
   0x4   :  { %s30_s16 = sshll.u32 %s675_s15, 4  ;;  %s18_s18 = sshll.u32 %s676_s17, 4  ;;  %s31_s16 = int_to_ptr.vmem [resolvable:$true] %s30_s16  ;;  %s711_s18 = int_to_ptr.vmem [resolvable:$true] %s18_s18 }
   0x5   :  { %s557_s21 = scalar_lea.hbm %s817_s1, 256 }
   0x6   :  { %p558_p0 = scmp.ne.s32.totalorder %s817_s1, %s557_s21  ;;  %p561_p1 = scmp.lt.u32.totalorder %s557_s21, %s817_s1 }
   0x8   :  { %p563_p2 = pnand %p561_p1, %p558_p0 }
   0xa   :  { %566 = shalt.err (!%p563_p2)
}
   0xb   :  { %s567_s26 = scalar_lea.vmem %s31_s16, 256  ;;  %p572_p4 = scmp.lt.s32.totalorder %s31_s16, %s31_s16 }
   0xc   :  { %p568_p3 = scmp.ne.s32.totalorder %s31_s16, %s567_s26  ;;  %p573_p5 = scmp.lt.s32.totalorder %s567_s26, %s567_s26 }
   0xe   :  { %p574_p6 = por %p573_p5, %p572_p4 }
  0x10   :  { %p575_p7 = pnand %p574_p6, %p568_p3 }
  0x12   :  { %578 = shalt.err (!%p575_p7)
}
  0x13   :  { %s677_s27 = smov 128   ;;  %s678_s28 = smov 8  }
  0x14   :  { %36 = dma.hbm_to_vmem [thread:$0]  %s817_s1, 256, %s31_s16, [#allocation6], %s677_s27, %s677_s27, %s678_s28  }
  0x15   :  { %s579_s7 = scalar_lea.hbm %s816_s0, 256 }
  0x16   :  { %p580_p8 = scmp.ne.s32.totalorder %s816_s0, %s579_s7  ;;  %p583_p9 = scmp.lt.u32.totalorder %s579_s7, %s816_s0 }
  0x18   :  { %p585_p10 = pnand %p583_p9, %p580_p8 }
  0x1a   :  { %588 = shalt.err (!%p585_p10)
}
  0x1b   :  { %s589_s12 = scalar_lea.vmem %s711_s18, 256  ;;  %p594_p12 = scmp.lt.s32.totalorder %s711_s18, %s711_s18 }
  0x1c   :  { %p590_p11 = scmp.ne.s32.totalorder %s711_s18, %s589_s12  ;;  %p595_p13 = scmp.lt.s32.totalorder %s589_s12, %s589_s12 }
  0x1e   :  { %p596_p0 = por %p595_p13, %p594_p12 }
  0x20   :  { %p597_p1 = pnand %p596_p0, %p590_p11 }
  0x22   :  { %600 = shalt.err (!%p597_p1)
}
  0x23   :  { %24 = dma.hbm_to_vmem [thread:$0]  %s816_s0, 256, %s711_s18, [#allocation3], %s677_s27, %s677_s27, %s678_s28  }
  0x24   :  { %s679_s14 = smov [#allocation7]   ;;  %s601_s19 = scalar_lea.hbm %s818_s2, 640 }
  0x25   :  { %s42_s15 = sshll.u32 %s679_s14, 4  ;;  %p602_p2 = scmp.ne.s32.totalorder %s818_s2, %s601_s19  ;;  %s43_s15 = int_to_ptr.vmem [resolvable:$true] %s42_s15 }
  0x26   :  { %p605_p3 = scmp.lt.u32.totalorder %s601_s19, %s818_s2 }
  0x28   :  { %p607_p4 = pnand %p605_p3, %p602_p2 }
  0x2a   :  { %610 = shalt.err (!%p607_p4)
}
  0x2b   :  { %s611_s24 = scalar_lea.vmem %s43_s15, 640  ;;  %p616_p6 = scmp.lt.s32.totalorder %s43_s15, %s43_s15 }
  0x2c   :  { %p612_p5 = scmp.ne.s32.totalorder %s43_s15, %s611_s24  ;;  %p617_p7 = scmp.lt.s32.totalorder %s611_s24, %s611_s24 }
  0x2e   :  { %p618_p8 = por %p617_p7, %p616_p6 }
  0x30   :  { %p619_p9 = pnand %p618_p8, %p612_p5 }
  0x32   :  { %622 = shalt.err (!%p619_p9)
}
  0x33   :  { %s680_s0 = smov 64   ;;  %s681_s18 = smov 4  }
  0x34   :  { %48 = dma.hbm_to_vmem [thread:$0]  %s818_s2, 640, %s43_s15, [#allocation6], %s680_s0, %s680_s0, %s681_s18  }
  0x35   :  { %s682_s27 = smov [#allocation8]   ;;  %s623_s5 = scalar_lea.hbm %s819_s3, 1024 }
  0x36   :  { %s54_s28 = sshll.u32 %s682_s27, 4  ;;  %p624_p10 = scmp.ne.s32.totalorder %s819_s3, %s623_s5  ;;  %s55_s28 = int_to_ptr.vmem [resolvable:$true] %s54_s28 }
  0x37   :  { %p627_p11 = scmp.lt.u32.totalorder %s623_s5, %s819_s3 }
  0x39   :  { %p629_p12 = pnand %p627_p11, %p624_p10 }
  0x3b   :  { %632 = shalt.err (!%p629_p12)
}
  0x3c   :  { %s633_s10 = scalar_lea.vmem %s55_s28, 1024  ;;  %p638_p0 = scmp.lt.s32.totalorder %s55_s28, %s55_s28 }
  0x3d   :  { %p634_p13 = scmp.ne.s32.totalorder %s55_s28, %s633_s10  ;;  %p639_p1 = scmp.lt.s32.totalorder %s633_s10, %s633_s10 }
  0x3f   :  { %p640_p2 = por %p639_p1, %p638_p0 }
  0x41   :  { %p641_p3 = pnand %p640_p2, %p634_p13 }
  0x43   :  { %644 = shalt.err (!%p641_p3)
}
  0x44   :  { %60 = dma.hbm_to_vmem [thread:$0]  %s819_s3, 1024, %s55_s28, [#allocation9], %s680_s0, %s680_s0, %s681_s18  }
  0x45   :  { %667 = dma.done.wait [#allocation3], 256  }
  0x46   :  { %668 = vsyncadd [#allocation3], 4294967040 }
  0x47   :  { %669 = dma.done.wait [#allocation6], 896  }
  0x48   :  { %670 = vsyncadd [#allocation6], 4294966400 }
  0x49   :  { %671 = dma.done.wait [#allocation9], 1024  }
  0x4a   :  { %672 = vsyncadd [#allocation9], 4294966272  ;;  %v683_v0 = vmov 0.0   ;;  %vm684_vm0 = vmmov 0   ;;  %v74_v1 = vld [vmem:[#allocation2] sm:$0xff]  ;;  %v75_v2 = vld [vmem:[#allocation2 + $0x8] sm:$0xff] }
  0x4b   :  { %461 = vmatprep.subr.bf16.mxu0 %v683_v0  ;;  %471 = vmatprep.mubr.msk.bf16.mxu0 %vm684_vm0, %v683_v0  ;;  %v76_v3 = vld [vmem:[#allocation5] sm:$0xff]  ;;  %v84_v4 = vpack.c.bf16 %v75_v2, %v74_v1  ;;  %v77_v5 = vld [vmem:[#allocation5 + $0x8] sm:$0xff]  ;;  %v78_v7 = vmul.f32 %v74_v1, %v74_v1  ;;  %v79_v8 = vmul.f32 %v75_v2, %v75_v2  ;;  %v545_v12 = vld [vmem:[#allocation8] sm:$0xff]   ;;  %vm124_vm1 = vcmask 654336   ;;  %s685_s3 = smov [#allocation10]  }
  0x4c   :  { %491 = vmatprep.subr.bf16.mxu1 %v683_v0  ;;  %507 = vmatprep.mubr.msk.bf16.mxu1 %vm684_vm0, %v683_v0  ;;  %v85_v6 = vpack.c.bf16 %v77_v5, %v76_v3  ;;  %v80_v10 = vmul.f32 %v76_v3, %v76_v3  ;;  %v81_v11 = vmul.f32 %v77_v5, %v77_v5  ;;  %v546_v13 = vld [vmem:[#allocation8 + $0x8] sm:$0xff]   ;;  %v547_v17 = vld [vmem:[#allocation8 + $0x10] sm:$0xff]   ;;  %v548_v19 = vld [vmem:[#allocation8 + $0x18] sm:$0xff]   ;;  %s409_s12 = sshll.u32 %s685_s3, 4  ;;  %s410_s12 = int_to_ptr.vmem [resolvable:$true] %s409_s12 }
  0x4d   :  { %462 = vmatpush3.bf16.msra.mxu0 %v84_v4  ;;  %v86_v9 = vpack.c.bf16 %v79_v8, %v78_v7  ;;  %492 = vmatpush3.bf16.msra.mxu1 %v545_v12  ;;  %v82_v15 = vmul.f32 %v76_v3, %v74_v1  ;;  %v83_v16 = vmul.f32 %v77_v5, %v75_v2  ;;  %v540_v20 = vld [vmem:[#allocation7] sm:$0xff]   ;;  %v549_v21 = vld [vmem:[#allocation8 + $0x20] sm:$0xff]   ;;  %v550_v22 = vld [vmem:[#allocation8 + $0x28] sm:$0xff]   ;;  %s645_s13 = scalar_lea.vmem %s410_s12, 128  ;;  %p650_p5 = scmp.lt.s32.totalorder %s410_s12, %s410_s12 }
  0x4e   :  { %463 = vmatprep.subr.bf16.mxu0 %v683_v0  ;;  %493 = vmatprep.subr.bf16.mxu1 %v683_v0  ;;  %v87_v14 = vpack.c.bf16 %v81_v11, %v80_v10  ;;  %v541_v23 = vld [vmem:[#allocation7 + $0x8] sm:$0xff]   ;;  %v551_v24 = vld [vmem:[#allocation8 + $0x30] sm:$0xff]   ;;  %v542_v25 = vld [vmem:[#allocation7 + $0x10] sm:$0xff]   ;;  %p646_p4 = scmp.ne.s32.totalorder %s410_s12, %s645_s13  ;;  %p651_p6 = scmp.lt.s32.totalorder %s645_s13, %s645_s13 }
  0x4f   :  { %v88_v18 = vpack.c.bf16 %v83_v16, %v82_v15  ;;  %v543_v26 = vld [vmem:[#allocation7 + $0x18] sm:$0xff]   ;;  %v544_v27 = vld [vmem:[#allocation7 + $0x20] sm:$0xff]  }
  0x50   :  { %v552_v28 = vld [vmem:[#allocation8 + $0x38] sm:$0xff]   ;;  %p652_p7 = por %p651_p6, %p650_p5 }
  0x51   :  { %464 = vmatpush3.bf16.msra.mxu0 %v85_v6  ;;  %494 = vmatpush3.bf16.msra.mxu1 %v546_v13 }
  0x52   :  { %465 = vmatprep.subr.bf16.mxu0 %v683_v0  ;;  %495 = vmatprep.subr.bf16.mxu1 %v683_v0  ;;  %p653_p8 = pnand %p652_p7, %p646_p4 }
  0x55   :  { %466 = vmatpush3.bf16.msra.mxu0 %v86_v9  ;;  %496 = vmatpush3.bf16.msra.mxu1 %v547_v17 }
  0x56   :  { %467 = vmatprep.subr.bf16.mxu0 %v683_v0  ;;  %497 = vmatprep.subr.bf16.mxu1 %v683_v0 }
  0x59   :  { %468 = vmatpush3.bf16.msra.mxu0 %v87_v14  ;;  %498 = vmatpush3.bf16.msra.mxu1 %v548_v19 }
  0x5a   :  { %469 = vmatprep.subr.bf16.mxu0 %v683_v0  ;;  %499 = vmatprep.subr.bf16.mxu1 %v683_v0 }
  0x5d   :  { %470 = vmatpush3.bf16.msra.mxu0 %v88_v18  ;;  %500 = vmatpush3.bf16.msra.mxu1 %v549_v21 }
  0x5e   :  { %501 = vmatprep.subr.bf16.mxu1 %v683_v0 }
  0x60   :  { %472 = vmatmul.mubr.msk.bf16.vlgmr.msra.gmra.mrb[0].mxu0 %vm124_vm1, %v540_v20 }
  0x61   :  { %475 = vmatprep.mubr.msk.bf16.mxu0 %vm684_vm0, %v683_v0  ;;  %502 = vmatpush3.bf16.msra.mxu1 %v550_v22 }
  0x62   :  { %503 = vmatprep.subr.bf16.mxu1 %v683_v0 }
  0x65   :  { %504 = vmatpush3.bf16.msra.mxu1 %v551_v24 }
  0x66   :  { %505 = vmatprep.subr.bf16.mxu1 %v683_v0 }
  0x68   :  { %476 = vmatmul.mubr.msk.bf16.gmra.mrb[4].mxu0 %vm124_vm1, %v541_v23 }
  0x69   :  { %479 = vmatprep.mubr.msk.bf16.mxu0 %vm684_vm0, %v683_v0  ;;  %506 = vmatpush3.bf16.msra.mxu1 %v552_v28 }
  0x70   :  { %480 = vmatmul.mubr.msk.bf16.gmra.mrb[8].mxu0 %vm124_vm1, %v542_v25 }
  0x71   :  { %483 = vmatprep.mubr.msk.bf16.mxu0 %vm684_vm0, %v683_v0 }
  0x78   :  { %484 = vmatmul.mubr.msk.bf16.gmra.mrb[12].mxu0 %vm124_vm1, %v543_v26 }
  0x79   :  { %487 = vmatprep.mubr.msk.bf16.mxu0 %vm684_vm0, %v683_v0 }
  0x80   :  { %488 = vmatmul.mubr.msk.bf16.gmra.mrb[16].mxu0 %vm124_vm1, %v544_v27 }
 0x133   :  { %v174_v29 = vpop.f32.mrb[0].mxu0 }
 0x134   :  { %v473_v30 = vpop.f32.mrb[1].mxu0 }
 0x135   :  { %v177_v31 = vpop.f32.mrb[2].mxu0 }
 0x136   :  { %v213_v32 = vpack.c.bf16 %v177_v31, %v174_v29  ;;  %v474_v33 = vpop.f32.mrb[3].mxu0 }
 0x138   :  { %508 = vmatmul.mubr.bf16.vlgmr.msra.gmra.mrb[0].mxu1 %v213_v32 }
 0x139   :  { %511 = vmatprep.mubr.msk.bf16.mxu1 %vm684_vm0, %v683_v0 }
 0x13b   :  { %v182_v34 = vpop.f32.mrb[4].mxu0 }
 0x13c   :  { %v477_v35 = vpop.f32.mrb[5].mxu0 }
 0x13d   :  { %v185_v36 = vpop.f32.mrb[6].mxu0 }
 0x13e   :  { %v214_v37 = vpack.c.bf16 %v185_v36, %v182_v34  ;;  %v478_v38 = vpop.f32.mrb[7].mxu0 }
 0x140   :  { %512 = vmatmul.mubr.bf16.gmra.mrb[4].mxu1 %v214_v37 }
 0x141   :  { %515 = vmatprep.mubr.msk.bf16.mxu1 %vm684_vm0, %v683_v0 }
 0x143   :  { %v190_v39 = vpop.f32.mrb[8].mxu0 }
 0x144   :  { %v481_v40 = vpop.f32.mrb[9].mxu0 }
 0x145   :  { %v193_v41 = vpop.f32.mrb[10].mxu0 }
 0x146   :  { %v215_v42 = vpack.c.bf16 %v193_v41, %v190_v39  ;;  %v482_v43 = vpop.f32.mrb[11].mxu0 }
 0x148   :  { %516 = vmatmul.mubr.bf16.gmra.mrb[8].mxu1 %v215_v42 }
 0x149   :  { %519 = vmatprep.mubr.msk.bf16.mxu1 %vm684_vm0, %v683_v0 }
 0x14b   :  { %v198_v44 = vpop.f32.mrb[12].mxu0 }
 0x14c   :  { %v485_v45 = vpop.f32.mrb[13].mxu0 }
 0x14d   :  { %v201_v46 = vpop.f32.mrb[14].mxu0 }
 0x14e   :  { %v216_v47 = vpack.c.bf16 %v201_v46, %v198_v44  ;;  %v486_v48 = vpop.f32.mrb[15].mxu0 }
 0x150   :  { %520 = vmatmul.mubr.bf16.gmra.mrb[12].mxu1 %v216_v47 }
 0x151   :  { %523 = vmatprep.mubr.msk.bf16.mxu1 %vm684_vm0, %v683_v0 }
 0x153   :  { %v206_v49 = vpop.f32.mrb[16].mxu0 }
 0x154   :  { %v489_v50 = vpop.f32.mrb[17].mxu0 }
 0x155   :  { %v209_v51 = vpop.f32.mrb[18].mxu0 }
 0x156   :  { %v217_v52 = vpack.c.bf16 %v209_v51, %v206_v49  ;;  %v490_v53 = vpop.f32.mrb[19].mxu0 }
 0x158   :  { %524 = vmatmul.mubr.bf16.gmra.mrb[16].mxu1 %v217_v52 }
 0x20b   :  { %v316_v54 = vpop.f32.mrb[0].mxu1 }
 0x20c   :  { %v509_v55 = vpop.f32.mrb[1].mxu1  ;;  %v355_v59 = vmul.f32 %v316_v54, %v316_v54 }
 0x20d   :  { %v319_v56 = vpop.f32.mrb[2].mxu1 }
 0x20e   :  { %v510_v57 = vpop.f32.mrb[3].mxu1  ;;  %v356_v1 = vmul.f32 %v319_v56, %v319_v56 }
 0x213   :  { %v324_v58 = vpop.f32.mrb[4].mxu1 }
 0x214   :  { %v357_v60 = vmul.f32 %v324_v58, %v324_v58  ;;  %v359_v61 = vmul.f32 %v324_v58, %v316_v54  ;;  %v513_v62 = vpop.f32.mrb[5].mxu1 }
 0x215   :  { %v327_v63 = vpop.f32.mrb[6].mxu1 }
 0x216   :  { %v377_v2 = vadd.f32 %v357_v60, %v355_v59  ;;  %v358_v3 = vmul.f32 %v327_v63, %v327_v63  ;;  %v360_v0 = vmul.f32 %v327_v63, %v319_v56  ;;  %v514_v4 = vpop.f32.mrb[7].mxu1  ;;  %v367_v26 = vmul.f32 2.0, %v359_v61 }
 0x218   :  { %v378_v5 = vadd.f32 %v358_v3, %v356_v1  ;;  %v379_v19 = vadd.f32 0.0001, %v377_v2  ;;  %v368_v31 = vmul.f32 2.0, %v360_v0  ;;  %v369_v35 = vadd.f32 0.0001, %v367_v26 }
 0x21a   :  { %v380_v22 = vadd.f32 0.0001, %v378_v5  ;;  %v370_v38 = vadd.f32 0.0001, %v368_v31 }
 0x21b   :  { %v332_v6 = vpop.f32.mrb[8].mxu1 }
 0x21c   :  { %v361_v7 = vsub.f32 %v332_v6, %v355_v59  ;;  %v517_v8 = vpop.f32.mrb[9].mxu1 }
 0x21d   :  { %v335_v9 = vpop.f32.mrb[10].mxu1 }
 0x21e   :  { %v362_v10 = vsub.f32 %v335_v9, %v356_v1  ;;  %v518_v11 = vpop.f32.mrb[11].mxu1 }
 0x223   :  { %v340_v12 = vpop.f32.mrb[12].mxu1 }
 0x224   :  { %v363_v13 = vsub.f32 %v340_v12, %v357_v60  ;;  %v521_v14 = vpop.f32.mrb[13].mxu1 }
 0x225   :  { %v343_v15 = vpop.f32.mrb[14].mxu1 }
 0x226   :  { %v381_v16 = vadd.f32 %v363_v13, %v361_v7  ;;  %v364_v17 = vsub.f32 %v343_v15, %v358_v3  ;;  %v522_v18 = vpop.f32.mrb[15].mxu1 }
 0x228   :  { %v383_v20 = vadd.f32 0.0009, %v381_v16  ;;  %v382_v21 = vadd.f32 %v364_v17, %v362_v10 }
 0x22a   :  { %v385_v23 = vmul.f32 %v383_v20, %v379_v19  ;;  %v384_v24 = vadd.f32 0.0009, %v382_v21 }
 0x22b   :  { %v348_v25 = vpop.f32.mrb[16].mxu1 }
 0x22c   :  { %553 = vrcp.f32 %v385_v23  ;;  %v386_v27 = vmul.f32 %v384_v24, %v380_v22  ;;  %v365_v28 = vsub.f32 %v348_v25, %v359_v61  ;;  %v525_v29 = vpop.f32.mrb[17].mxu1 }
 0x22d   :  { %v351_v30 = vpop.f32.mrb[18].mxu1 }
 0x22e   :  { %555 = vrcp.f32 %v386_v27  ;;  %v371_v32 = vmul.f32 2.0, %v365_v28  ;;  %v366_v33 = vsub.f32 %v351_v30, %v360_v0  ;;  %v526_v34 = vpop.f32.mrb[19].mxu1 }
 0x230   :  { %v373_v36 = vadd.f32 0.0009, %v371_v32  ;;  %v372_v37 = vmul.f32 2.0, %v366_v33 }
 0x232   :  { %v375_v39 = vmul.f32 %v373_v36, %v369_v35  ;;  %v374_v40 = vadd.f32 0.0009, %v372_v37 }
 0x234   :  { %v376_v41 = vmul.f32 %v374_v40, %v370_v38 }
 0x236   :  { %v554_v42 = vpop.eup %553 }
 0x237   :  { %v388_v43 = vmul.f32 %v554_v42, %v375_v39 }
 0x238   :  { %v556_v44 = vpop.eup %555 }
 0x239   :  { %v390_v45 = vmul.f32 %v556_v44, %v376_v41 }
 0x23b   :  { %v391_v46 = vadd.f32 %v390_v45, %v388_v43 }
 0x23d   :  { %392 = vadd.xlane.f32.xlu0 %v391_v46 }
 0x2ca   :  { %v393_v47 = vpop.xlane.xlu0 %392 }
 0x2cb   :  { %v394_v48 = vrot.slane %v393_v47, 4 }
 0x2cd   :  { %v395_v49 = vadd.f32 %v394_v48, %v393_v47 }
 0x2cf   :  { %v396_v50 = vrot.slane %v395_v49, 2 }
 0x2d1   :  { %v397_v51 = vadd.f32 %v396_v50, %v395_v49 }
 0x2d3   :  { %v398_v52 = vrot.slane %v397_v51, 1 }
 0x2d5   :  { %v399_v53 = vadd.f32 %v398_v52, %v397_v51 }
 0x2d7   :  { %527 = vpush %v399_v53 }
 0x308   :  { %s528_s1 = spop %527 }
 0x309   :  { %v401_v54 = vstv %s528_s1 }
 0x30a   :  { %402 = vst [vmem:[#allocation10] sm:$0xff] %v401_v54 }
 0x30b   :  { %656 = shalt.err (!%p653_p8)
}
 0x30c   :  { %s657_s16 = scalar_lea.hbm %s820_s4, 128 }
 0x30d   :  { %p658_p9 = scmp.ne.s32.totalorder %s820_s4, %s657_s16  ;;  %p661_p10 = scmp.lt.u32.totalorder %s657_s16, %s820_s4 }
 0x30f   :  { %p663_p11 = pnand %p661_p10, %p658_p9 }
 0x311   :  { %666 = shalt.err (!%p663_p11)
}
 0x312   :  { %412 = dma.vmem_to_hbm [thread:$0]  %s410_s12, 128, %s820_s4, [#allocation4]  }
 0x313   :  { %673 = dma.done.wait [#allocation4], 128  }
 0x314   :  { %674 = vsyncadd [#allocation4], 4294967168 }
 0x315   :  { %416 = vsyncpa [#allocation3], 1 }
 0x316   :  { %417 = vsyncpa [#allocation6], 1 }
 0x317   :  { %418 = vsyncpa [#allocation9], 1 }
 0x318   :  { %419 = vsyncpa [#allocation4], 1 }

// kernel: tpu_custom_call.1
= control target key start
LH: loop header
LB: loop body
LE: loop exit
PB: predicated region body
PF: predicated region fallthrough
CT: control target
= control target key end

     0   :  { %9 = vsyncpa [#allocation3], 0  ;;  %s816_s0 = inlined_call_operand.hbm [shape: f32[16,128], index: 0, kind: input, shape index: {}]   ;;  %s817_s1 = inlined_call_operand.hbm [shape: f32[16,128], index: 1, kind: input, shape index: {}]   ;;  %s818_s2 = inlined_call_operand.hbm [shape: bf16[80,80], index: 2, kind: input, shape index: {}]   ;;  %s819_s3 = inlined_call_operand.hbm [shape: bf16[128,128], index: 3, kind: input, shape index: {}]   ;;  %s820_s4 = inlined_call_operand.hbm [shape: f32[1,8,128], index: 4, kind: output, shape index: {}]  }
   0x1   :  { %10 = vsyncpa [#allocation6], 0 }
   0x2   :  { %11 = vsyncpa [#allocation9], 0 }
   0x3   :  { %12 = vsyncpa [#allocation4], 0  ;;  %s675_s15 = smov [#allocation5]   ;;  %s676_s17 = smov [#allocation2]  }
   0x4   :  { %s30_s16 = sshll.u32 %s675_s15, 4  ;;  %s18_s18 = sshll.u32 %s676_s17, 4  ;;  %s31_s16 = int_to_ptr.vmem [resolvable:$true] %s30_s16  ;;  %s711_s18 = int_to_ptr.vmem [resolvable:$true] %s18_s18 }
   0x5   :  { %s557_s21 = scalar_lea.hbm %s817_s1, 256 }
   0x6   :  { %p558_p0 = scmp.ne.s32.totalorder %s817_s1, %s557_s21  ;;  %p561_p1 = scmp.lt.u32.totalorder %s557_s21, %s817_s1 }
   0x8   :  { %p563_p2 = pnand %p561_p1, %p558_p0 }
   0xa   :  { %566 = shalt.err (!%p563_p2)
}
   0xb   :  { %s567_s26 = scalar_lea.vmem %s31_s16, 256  ;;  %p572_p4 = scmp.lt.s32.totalorder %s31_s16, %s31_s16 }
   0xc   :  { %p568_p3 = scmp.ne.s32.totalorder %s31_s16, %s567_s26  ;;  %p573_p5 = scmp.lt.s32.totalorder %s567_s26, %s567_s26 }
   0xe   :  { %p574_p6 = por %p573_p5, %p572_p4 }
  0x10   :  { %p575_p7 = pnand %p574_p6, %p568_p3 }
  0x12   :  { %578 = shalt.err (!%p575_p7)
}
  0x13   :  { %s677_s27 = smov 128   ;;  %s678_s28 = smov 8  }
  0x14   :  { %36 = dma.hbm_to_vmem [thread:$0]  %s817_s1, 256, %s31_s16, [#allocation6], %s677_s27, %s677_s27, %s678_s28  }
  0x15   :  { %s579_s7 = scalar_lea.hbm %s816_s0, 256 }
  0x16   :  { %p580_p8 = scmp.ne.s32.totalorder %s816_s0, %s579_s7  ;;  %p583_p9 = scmp.lt.u32.totalorder %s579_s7, %s816_s0 }
  0x18   :  { %p585_p10 = pnand %p583_p9, %p580_p8 }
  0x1a   :  { %588 = shalt.err (!%p585_p10)
}
  0x1b   :  { %s589_s12 = scalar_lea.vmem %s711_s18, 256  ;;  %p594_p12 = scmp.lt.s32.totalorder %s711_s18, %s711_s18 }
  0x1c   :  { %p590_p11 = scmp.ne.s32.totalorder %s711_s18, %s589_s12  ;;  %p595_p13 = scmp.lt.s32.totalorder %s589_s12, %s589_s12 }
  0x1e   :  { %p596_p0 = por %p595_p13, %p594_p12 }
  0x20   :  { %p597_p1 = pnand %p596_p0, %p590_p11 }
  0x22   :  { %600 = shalt.err (!%p597_p1)
}
  0x23   :  { %24 = dma.hbm_to_vmem [thread:$0]  %s816_s0, 256, %s711_s18, [#allocation3], %s677_s27, %s677_s27, %s678_s28  }
  0x24   :  { %s679_s14 = smov [#allocation7]   ;;  %s601_s19 = scalar_lea.hbm %s818_s2, 640 }
  0x25   :  { %s42_s15 = sshll.u32 %s679_s14, 4  ;;  %p602_p2 = scmp.ne.s32.totalorder %s818_s2, %s601_s19  ;;  %s43_s15 = int_to_ptr.vmem [resolvable:$true] %s42_s15 }
  0x26   :  { %p605_p3 = scmp.lt.u32.totalorder %s601_s19, %s818_s2 }
  0x28   :  { %p607_p4 = pnand %p605_p3, %p602_p2 }
  0x2a   :  { %610 = shalt.err (!%p607_p4)
}
  0x2b   :  { %s611_s24 = scalar_lea.vmem %s43_s15, 640  ;;  %p616_p6 = scmp.lt.s32.totalorder %s43_s15, %s43_s15 }
  0x2c   :  { %p612_p5 = scmp.ne.s32.totalorder %s43_s15, %s611_s24  ;;  %p617_p7 = scmp.lt.s32.totalorder %s611_s24, %s611_s24 }
  0x2e   :  { %p618_p8 = por %p617_p7, %p616_p6 }
  0x30   :  { %p619_p9 = pnand %p618_p8, %p612_p5 }
  0x32   :  { %622 = shalt.err (!%p619_p9)
}
  0x33   :  { %s680_s0 = smov 64   ;;  %s681_s18 = smov 4  }
  0x34   :  { %48 = dma.hbm_to_vmem [thread:$0]  %s818_s2, 640, %s43_s15, [#allocation6], %s680_s0, %s680_s0, %s681_s18  }
  0x35   :  { %s682_s27 = smov [#allocation8]   ;;  %s623_s5 = scalar_lea.hbm %s819_s3, 1024 }
  0x36   :  { %s54_s28 = sshll.u32 %s682_s27, 4  ;;  %p624_p10 = scmp.ne.s32.totalorder %s819_s3, %s623_s5  ;;  %s55_s28 = int_to_ptr.vmem [resolvable:$true] %s54_s28 }
  0x37   :  { %p627_p11 = scmp.lt.u32.totalorder %s623_s5, %s819_s3 }
  0x39   :  { %p629_p12 = pnand %p627_p11, %p624_p10 }
  0x3b   :  { %632 = shalt.err (!%p629_p12)
}
  0x3c   :  { %s633_s10 = scalar_lea.vmem %s55_s28, 1024  ;;  %p638_p0 = scmp.lt.s32.totalorder %s55_s28, %s55_s28 }
  0x3d   :  { %p634_p13 = scmp.ne.s32.totalorder %s55_s28, %s633_s10  ;;  %p639_p1 = scmp.lt.s32.totalorder %s633_s10, %s633_s10 }
  0x3f   :  { %p640_p2 = por %p639_p1, %p638_p0 }
  0x41   :  { %p641_p3 = pnand %p640_p2, %p634_p13 }
  0x43   :  { %644 = shalt.err (!%p641_p3)
}
  0x44   :  { %60 = dma.hbm_to_vmem [thread:$0]  %s819_s3, 1024, %s55_s28, [#allocation9], %s680_s0, %s680_s0, %s681_s18  }
  0x45   :  { %667 = dma.done.wait [#allocation3], 256  }
  0x46   :  { %668 = vsyncadd [#allocation3], 4294967040 }
  0x47   :  { %669 = dma.done.wait [#allocation6], 896  }
  0x48   :  { %670 = vsyncadd [#allocation6], 4294966400 }
  0x49   :  { %671 = dma.done.wait [#allocation9], 1024  }
  0x4a   :  { %672 = vsyncadd [#allocation9], 4294966272  ;;  %v683_v0 = vmov 0.0   ;;  %vm684_vm0 = vmmov 0   ;;  %v74_v1 = vld [vmem:[#allocation2] sm:$0xff]  ;;  %v75_v2 = vld [vmem:[#allocation2 + $0x8] sm:$0xff] }
  0x4b   :  { %461 = vmatprep.subr.bf16.mxu0 %v683_v0  ;;  %471 = vmatprep.mubr.msk.bf16.mxu0 %vm684_vm0, %v683_v0  ;;  %v76_v3 = vld [vmem:[#allocation5] sm:$0xff]  ;;  %v84_v4 = vpack.c.bf16 %v75_v2, %v74_v1  ;;  %v77_v5 = vld [vmem:[#allocation5 + $0x8] sm:$0xff]  ;;  %v78_v7 = vmul.f32 %v74_v1, %v74_v1  ;;  %v79_v8 = vmul.f32 %v75_v2, %v75_v2  ;;  %v545_v12 = vld [vmem:[#allocation8] sm:$0xff]   ;;  %vm124_vm1 = vcmask 654336   ;;  %s685_s3 = smov [#allocation10]  }
  0x4c   :  { %491 = vmatprep.subr.bf16.mxu1 %v683_v0  ;;  %507 = vmatprep.mubr.msk.bf16.mxu1 %vm684_vm0, %v683_v0  ;;  %v85_v6 = vpack.c.bf16 %v77_v5, %v76_v3  ;;  %v80_v10 = vmul.f32 %v76_v3, %v76_v3  ;;  %v81_v11 = vmul.f32 %v77_v5, %v77_v5  ;;  %v546_v13 = vld [vmem:[#allocation8 + $0x8] sm:$0xff]   ;;  %v547_v17 = vld [vmem:[#allocation8 + $0x10] sm:$0xff]   ;;  %v548_v19 = vld [vmem:[#allocation8 + $0x18] sm:$0xff]   ;;  %s409_s12 = sshll.u32 %s685_s3, 4  ;;  %s410_s12 = int_to_ptr.vmem [resolvable:$true] %s409_s12 }
  0x4d   :  { %462 = vmatpush3.bf16.msra.mxu0 %v84_v4  ;;  %v86_v9 = vpack.c.bf16 %v79_v8, %v78_v7  ;;  %492 = vmatpush3.bf16.msra.mxu1 %v545_v12  ;;  %v82_v15 = vmul.f32 %v76_v3, %v74_v1  ;;  %v83_v16 = vmul.f32 %v77_v5, %v75_v2  ;;  %v540_v20 = vld [vmem:[#allocation7] sm:$0xff]   ;;  %v549_v21 = vld [vmem:[#allocation8 + $0x20] sm:$0xff]   ;;  %v550_v22 = vld [vmem:[#allocation8 + $0x28] sm:$0xff]   ;;  %s645_s13 = scalar_lea.vmem %s410_s12, 128  ;;  %p650_p5 = scmp.lt.s32.totalorder %s410_s12, %s410_s12 }
  0x4e   :  { %463 = vmatprep.subr.bf16.mxu0 %v683_v0  ;;  %493 = vmatprep.subr.bf16.mxu1 %v683_v0  ;;  %v87_v14 = vpack.c.bf16 %v81_v11, %v80_v10  ;;  %v541_v23 = vld [vmem:[#allocation7 + $0x8] sm:$0xff]   ;;  %v551_v24 = vld [vmem:[#allocation8 + $0x30] sm:$0xff]   ;;  %v542_v25 = vld [vmem:[#allocation7 + $0x10] sm:$0xff]   ;;  %p646_p4 = scmp.ne.s32.totalorder %s410_s12, %s645_s13  ;;  %p651_p6 = scmp.lt.s32.totalorder %s645_s13, %s645_s13 }
  0x4f   :  { %v88_v18 = vpack.c.bf16 %v83_v16, %v82_v15  ;;  %v543_v26 = vld [vmem:[#allocation7 + $0x18] sm:$0xff]   ;;  %v544_v27 = vld [vmem:[#allocation7 + $0x20] sm:$0xff]  }
  0x50   :  { %v552_v28 = vld [vmem:[#allocation8 + $0x38] sm:$0xff]   ;;  %p652_p7 = por %p651_p6, %p650_p5 }
  0x51   :  { %464 = vmatpush3.bf16.msra.mxu0 %v85_v6  ;;  %494 = vmatpush3.bf16.msra.mxu1 %v546_v13 }
  0x52   :  { %465 = vmatprep.subr.bf16.mxu0 %v683_v0  ;;  %495 = vmatprep.subr.bf16.mxu1 %v683_v0  ;;  %p653_p8 = pnand %p652_p7, %p646_p4 }
  0x55   :  { %466 = vmatpush3.bf16.msra.mxu0 %v86_v9  ;;  %496 = vmatpush3.bf16.msra.mxu1 %v547_v17 }
  0x56   :  { %467 = vmatprep.subr.bf16.mxu0 %v683_v0  ;;  %497 = vmatprep.subr.bf16.mxu1 %v683_v0 }
  0x59   :  { %468 = vmatpush3.bf16.msra.mxu0 %v87_v14  ;;  %498 = vmatpush3.bf16.msra.mxu1 %v548_v19 }
  0x5a   :  { %469 = vmatprep.subr.bf16.mxu0 %v683_v0  ;;  %499 = vmatprep.subr.bf16.mxu1 %v683_v0 }
  0x5d   :  { %470 = vmatpush3.bf16.msra.mxu0 %v88_v18  ;;  %500 = vmatpush3.bf16.msra.mxu1 %v549_v21 }
  0x5e   :  { %501 = vmatprep.subr.bf16.mxu1 %v683_v0 }
  0x60   :  { %472 = vmatmul.mubr.msk.bf16.vlgmr.msra.gmra.mrb[0].mxu0 %vm124_vm1, %v540_v20 }
  0x61   :  { %475 = vmatprep.mubr.msk.bf16.mxu0 %vm684_vm0, %v683_v0  ;;  %502 = vmatpush3.bf16.msra.mxu1 %v550_v22 }
  0x62   :  { %503 = vmatprep.subr.bf16.mxu1 %v683_v0 }
  0x65   :  { %504 = vmatpush3.bf16.msra.mxu1 %v551_v24 }
  0x66   :  { %505 = vmatprep.subr.bf16.mxu1 %v683_v0 }
  0x68   :  { %476 = vmatmul.mubr.msk.bf16.gmra.mrb[4].mxu0 %vm124_vm1, %v541_v23 }
  0x69   :  { %479 = vmatprep.mubr.msk.bf16.mxu0 %vm684_vm0, %v683_v0  ;;  %506 = vmatpush3.bf16.msra.mxu1 %v552_v28 }
  0x70   :  { %480 = vmatmul.mubr.msk.bf16.gmra.mrb[8].mxu0 %vm124_vm1, %v542_v25 }
  0x71   :  { %483 = vmatprep.mubr.msk.bf16.mxu0 %vm684_vm0, %v683_v0 }
  0x78   :  { %484 = vmatmul.mubr.msk.bf16.gmra.mrb[12].mxu0 %vm124_vm1, %v543_v26 }
  0x79   :  { %487 = vmatprep.mubr.msk.bf16.mxu0 %vm684_vm0, %v683_v0 }
  0x80   :  { %488 = vmatmul.mubr.msk.bf16.gmra.mrb[16].mxu0 %vm124_vm1, %v544_v27 }
 0x133   :  { %v174_v29 = vpop.f32.mrb[0].mxu0 }
 0x134   :  { %v473_v30 = vpop.f32.mrb[1].mxu0 }
 0x135   :  { %v177_v31 = vpop.f32.mrb[2].mxu0 }
 0x136   :  { %v213_v32 = vpack.c.bf16 %v177_v31, %v174_v29  ;;  %v474_v33 = vpop.f32.mrb[3].mxu0 }
 0x138   :  { %508 = vmatmul.mubr.bf16.vlgmr.msra.gmra.mrb[0].mxu1 %v213_v32 }
 0x139   :  { %511 = vmatprep.mubr.msk.bf16.mxu1 %vm684_vm0, %v683_v0 }
 0x13b   :  { %v182_v34 = vpop.f32.mrb[4].mxu0 }
 0x13c   :  { %v477_v35 = vpop.f32.mrb[5].mxu0 }
 0x13d   :  { %v185_v36 = vpop.f32.mrb[6].mxu0 }
 0x13e   :  { %v214_v37 = vpack.c.bf16 %v185_v36, %v182_v34  ;;  %v478_v38 = vpop.f32.mrb[7].mxu0 }
 0x140   :  { %512 = vmatmul.mubr.bf16.gmra.mrb[4].mxu1 %v214_v37 }
 0x141   :  { %515 = vmatprep.mubr.msk.bf16.mxu1 %vm684_vm0, %v683_v0 }
 0x143   :  { %v190_v39 = vpop.f32.mrb[8].mxu0 }
 0x144   :  { %v481_v40 = vpop.f32.mrb[9].mxu0 }
 0x145   :  { %v193_v41 = vpop.f32.mrb[10].mxu0 }
 0x146   :  { %v215_v42 = vpack.c.bf16 %v193_v41, %v190_v39  ;;  %v482_v43 = vpop.f32.mrb[11].mxu0 }
 0x148   :  { %516 = vmatmul.mubr.bf16.gmra.mrb[8].mxu1 %v215_v42 }
 0x149   :  { %519 = vmatprep.mubr.msk.bf16.mxu1 %vm684_vm0, %v683_v0 }
 0x14b   :  { %v198_v44 = vpop.f32.mrb[12].mxu0 }
 0x14c   :  { %v485_v45 = vpop.f32.mrb[13].mxu0 }
 0x14d   :  { %v201_v46 = vpop.f32.mrb[14].mxu0 }
 0x14e   :  { %v216_v47 = vpack.c.bf16 %v201_v46, %v198_v44  ;;  %v486_v48 = vpop.f32.mrb[15].mxu0 }
 0x150   :  { %520 = vmatmul.mubr.bf16.gmra.mrb[12].mxu1 %v216_v47 }
 0x151   :  { %523 = vmatprep.mubr.msk.bf16.mxu1 %vm684_vm0, %v683_v0 }
 0x153   :  { %v206_v49 = vpop.f32.mrb[16].mxu0 }
 0x154   :  { %v489_v50 = vpop.f32.mrb[17].mxu0 }
 0x155   :  { %v209_v51 = vpop.f32.mrb[18].mxu0 }
 0x156   :  { %v217_v52 = vpack.c.bf16 %v209_v51, %v206_v49  ;;  %v490_v53 = vpop.f32.mrb[19].mxu0 }
 0x158   :  { %524 = vmatmul.mubr.bf16.gmra.mrb[16].mxu1 %v217_v52 }
 0x20b   :  { %v316_v54 = vpop.f32.mrb[0].mxu1 }
 0x20c   :  { %v509_v55 = vpop.f32.mrb[1].mxu1  ;;  %v355_v59 = vmul.f32 %v316_v54, %v316_v54 }
 0x20d   :  { %v319_v56 = vpop.f32.mrb[2].mxu1 }
 0x20e   :  { %v510_v57 = vpop.f32.mrb[3].mxu1  ;;  %v356_v1 = vmul.f32 %v319_v56, %v319_v56 }
 0x213   :  { %v324_v58 = vpop.f32.mrb[4].mxu1 }
 0x214   :  { %v357_v60 = vmul.f32 %v324_v58, %v324_v58  ;;  %v359_v61 = vmul.f32 %v324_v58, %v316_v54  ;;  %v513_v62 = vpop.f32.mrb[5].mxu1 }
 0x215   :  { %v327_v63 = vpop.f32.mrb[6].mxu1 }
 0x216   :  { %v377_v2 = vadd.f32 %v357_v60, %v355_v59  ;;  %v358_v3 = vmul.f32 %v327_v63, %v327_v63  ;;  %v360_v0 = vmul.f32 %v327_v63, %v319_v56  ;;  %v514_v4 = vpop.f32.mrb[7].mxu1  ;;  %v367_v26 = vmul.f32 2.0, %v359_v61 }
 0x218   :  { %v378_v5 = vadd.f32 %v358_v3, %v356_v1  ;;  %v379_v19 = vadd.f32 0.0001, %v377_v2  ;;  %v368_v31 = vmul.f32 2.0, %v360_v0  ;;  %v369_v35 = vadd.f32 0.0001, %v367_v26 }
 0x21a   :  { %v380_v22 = vadd.f32 0.0001, %v378_v5  ;;  %v370_v38 = vadd.f32 0.0001, %v368_v31 }
 0x21b   :  { %v332_v6 = vpop.f32.mrb[8].mxu1 }
 0x21c   :  { %v361_v7 = vsub.f32 %v332_v6, %v355_v59  ;;  %v517_v8 = vpop.f32.mrb[9].mxu1 }
 0x21d   :  { %v335_v9 = vpop.f32.mrb[10].mxu1 }
 0x21e   :  { %v362_v10 = vsub.f32 %v335_v9, %v356_v1  ;;  %v518_v11 = vpop.f32.mrb[11].mxu1 }
 0x223   :  { %v340_v12 = vpop.f32.mrb[12].mxu1 }
 0x224   :  { %v363_v13 = vsub.f32 %v340_v12, %v357_v60  ;;  %v521_v14 = vpop.f32.mrb[13].mxu1 }
 0x225   :  { %v343_v15 = vpop.f32.mrb[14].mxu1 }
 0x226   :  { %v381_v16 = vadd.f32 %v363_v13, %v361_v7  ;;  %v364_v17 = vsub.f32 %v343_v15, %v358_v3  ;;  %v522_v18 = vpop.f32.mrb[15].mxu1 }
 0x228   :  { %v383_v20 = vadd.f32 0.0009, %v381_v16  ;;  %v382_v21 = vadd.f32 %v364_v17, %v362_v10 }
 0x22a   :  { %v385_v23 = vmul.f32 %v383_v20, %v379_v19  ;;  %v384_v24 = vadd.f32 0.0009, %v382_v21 }
 0x22b   :  { %v348_v25 = vpop.f32.mrb[16].mxu1 }
 0x22c   :  { %553 = vrcp.f32 %v385_v23  ;;  %v386_v27 = vmul.f32 %v384_v24, %v380_v22  ;;  %v365_v28 = vsub.f32 %v348_v25, %v359_v61  ;;  %v525_v29 = vpop.f32.mrb[17].mxu1 }
 0x22d   :  { %v351_v30 = vpop.f32.mrb[18].mxu1 }
 0x22e   :  { %555 = vrcp.f32 %v386_v27  ;;  %v371_v32 = vmul.f32 2.0, %v365_v28  ;;  %v366_v33 = vsub.f32 %v351_v30, %v360_v0  ;;  %v526_v34 = vpop.f32.mrb[19].mxu1 }
 0x230   :  { %v373_v36 = vadd.f32 0.0009, %v371_v32  ;;  %v372_v37 = vmul.f32 2.0, %v366_v33 }
 0x232   :  { %v375_v39 = vmul.f32 %v373_v36, %v369_v35  ;;  %v374_v40 = vadd.f32 0.0009, %v372_v37 }
 0x234   :  { %v376_v41 = vmul.f32 %v374_v40, %v370_v38 }
 0x236   :  { %v554_v42 = vpop.eup %553 }
 0x237   :  { %v388_v43 = vmul.f32 %v554_v42, %v375_v39 }
 0x238   :  { %v556_v44 = vpop.eup %555 }
 0x239   :  { %v390_v45 = vmul.f32 %v556_v44, %v376_v41 }
 0x23b   :  { %v391_v46 = vadd.f32 %v390_v45, %v388_v43 }
 0x23d   :  { %392 = vadd.xlane.f32.xlu0 %v391_v46 }
 0x2ca   :  { %v393_v47 = vpop.xlane.xlu0 %392 }
 0x2cb   :  { %v394_v48 = vrot.slane %v393_v47, 4 }
 0x2cd   :  { %v395_v49 = vadd.f32 %v394_v48, %v393_v47 }
 0x2cf   :  { %v396_v50 = vrot.slane %v395_v49, 2 }
 0x2d1   :  { %v397_v51 = vadd.f32 %v396_v50, %v395_v49 }
 0x2d3   :  { %v398_v52 = vrot.slane %v397_v51, 1 }
 0x2d5   :  { %v399_v53 = vadd.f32 %v398_v52, %v397_v51 }
 0x2d7   :  { %527 = vpush %v399_v53 }
 0x308   :  { %s528_s1 = spop %527 }
 0x309   :  { %v401_v54 = vstv %s528_s1 }
 0x30a   :  { %402 = vst [vmem:[#allocation10] sm:$0xff] %v401_v54 }
 0x30b   :  { %656 = shalt.err (!%p653_p8)
}
 0x30c   :  { %s657_s16 = scalar_lea.hbm %s820_s4, 128 }
 0x30d   :  { %p658_p9 = scmp.ne.s32.totalorder %s820_s4, %s657_s16  ;;  %p661_p10 = scmp.lt.u32.totalorder %s657_s16, %s820_s4 }
 0x30f   :  { %p663_p11 = pnand %p661_p10, %p658_p9 }
 0x311   :  { %666 = shalt.err (!%p663_p11)
}
 0x312   :  { %412 = dma.vmem_to_hbm [thread:$0]  %s410_s12, 128, %s820_s4, [#allocation4]  }
 0x313   :  { %673 = dma.done.wait [#allocation4], 128  }
 0x314   :  { %674 = vsyncadd [#allocation4], 4294967168 }
 0x315   :  { %416 = vsyncpa [#allocation3], 1 }
 0x316   :  { %417 = vsyncpa [#allocation6], 1 }
 0x317   :  { %418 = vsyncpa [#allocation9], 1 }
 0x318   :  { %419 = vsyncpa [#allocation4], 1 }

</bundles_post_ra>
